<compile_context>
chip_gen: v6e
topology: v6e:2x2x1
jax: 0.10.0
libtpu: 0.0.40
codegen_flags: <defaults>
</compile_context>

<pallas_src>
import functools

import jax
import jax.numpy as jnp
from jax import lax
from jax.experimental import pallas as pl
from jax.experimental.pallas import tpu as pltpu

BN_EPS = 1e-5
_BN_VMEM_BUDGET = 28 << 20      # fused-BN double-buffered working-set budget


def _round_up(v, m):
    return ((v + m - 1) // m) * m


def _pad2(a, rows, cols, val=0.0):
    pr, pc = rows - a.shape[0], cols - a.shape[1]
    if pr == 0 and pc == 0:
        return a
    return jnp.pad(a, ((0, pr), (0, pc)), constant_values=val)


def _pick_tile(extent, unit, cap):
    """Largest multiple of `unit` that divides `extent` and is <= cap.

    `extent` is already padded to a multiple of `unit`, so the chosen tile never
    forces padding beyond the layout minimum (no extra full-array pad pass).
    """
    cap = max(unit, min(cap, extent))
    best, t = unit, unit
    while t <= cap:
        if extent % t == 0:
            best = t
        t += unit
    return best


def _ensure_two_parallel(Bp, tm, Dp, tn, row_align):
    # v7x has 2 TensorCores and shards 'parallel' grid axes across them; make
    # sure there are >= 2 parallel slices whenever the problem allows it
    # (harmless on the single-core v5e/v6e).
    while (Bp // tm) * (Dp // tn) < 2 and tn >= 256:
        tn = _pick_tile(Dp, 128, tn // 2)
    while (Bp // tm) * (Dp // tn) < 2 and tm >= 2 * row_align:
        tm = _pick_tile(Bp, row_align, tm // 2)
    return tm, tn


def _vmem_limit(ws_bytes):
    # Explicit scoped-VMEM limit (v5e default is only 16 MiB); keep headroom
    # for Mosaic internal scratch and stay below v7x's 64 MiB physical VMEM.
    return int(min(max(2 * ws_bytes, 24 << 20), 44 << 20))


# ------------------------------- kernels ------------------------------------

def _linear_kernel(x_ref, w_ref, b_ref, o_ref, acc_ref):
    """y = x @ W + b with the F-reduction on grid axis 2 (f32 accumulator)."""
    k = pl.program_id(2)

    @pl.when(k == 0)
    def _():
        acc_ref[...] = jnp.zeros_like(acc_ref)

    # Canonical (M,K)x(K,N) MXU feed: W was transposed once in the wrapper.
    acc_ref[...] += jnp.dot(x_ref[...], w_ref[...],
                            preferred_element_type=jnp.float32)

    @pl.when(k == pl.num_programs(2) - 1)
    def _():
        o_ref[...] = (acc_ref[...] + b_ref[...]).astype(o_ref.dtype)


def _linear_nk1_kernel(x_ref, w_ref, b_ref, o_ref):
    """Single-K-block fast path: no accumulator scratch / zero-init."""
    o_ref[...] = (jnp.dot(x_ref[...], w_ref[...],
                          preferred_element_type=jnp.float32)
                  + b_ref[...]).astype(o_ref.dtype)


def _bn_epilogue(y, g_ref, beta_ref, o_ref):
    mean = jnp.mean(y, axis=0, keepdims=True)
    c = y - mean                                   # centered once, reused
    var = jnp.mean(c * c, axis=0, keepdims=True)
    scale = g_ref[...] * lax.rsqrt(var + BN_EPS)   # gamma folded into scale
    o_ref[...] = (c * scale + beta_ref[...]).astype(o_ref.dtype)


def _linear_bn_kernel(x_ref, w_ref, b_ref, g_ref, beta_ref, o_ref, acc_ref):
    """Linear + training-mode BatchNorm1d; full batch resident per D tile."""
    k = pl.program_id(1)

    @pl.when(k == 0)
    def _():
        acc_ref[...] = jnp.zeros_like(acc_ref)

    acc_ref[...] += jnp.dot(x_ref[...], w_ref[...],
                            preferred_element_type=jnp.float32)

    @pl.when(k == pl.num_programs(1) - 1)
    def _():
        _bn_epilogue(acc_ref[...] + b_ref[...], g_ref, beta_ref, o_ref)


def _linear_bn_nk1_kernel(x_ref, w_ref, b_ref, g_ref, beta_ref, o_ref):
    y = jnp.dot(x_ref[...], w_ref[...],
                preferred_element_type=jnp.float32) + b_ref[...]
    _bn_epilogue(y, g_ref, beta_ref, o_ref)


# ------------------------------- builders ------------------------------------

def _linear_pallas(x, Wt, b, out_dtype, compute_dtype=None):
    """x: [B, F], Wt: [F, D] (pre-transposed), b: [D] -> [B, D]."""
    B, F = x.shape
    D = Wt.shape[1]
    cd = jnp.dtype(compute_dtype) if compute_dtype is not None else jnp.dtype(x.dtype)
    row_align = 16 if cd.itemsize < 4 else 8

    Bp, Fp, Dp = _round_up(B, row_align), _round_up(F, 128), _round_up(D, 128)
    tm = _pick_tile(Bp, row_align, 1024)
    tk = _pick_tile(Fp, 128, 1024)
    tn = _pick_tile(Dp, 128, 512)
    tm, tn = _ensure_two_parallel(Bp, tm, Dp, tn, row_align)
    nk = Fp // tk

    # x is re-streamed once per D tile; only pre-cast when that re-read exists.
    if compute_dtype is not None and Dp // tn > 1:
        x = x.astype(compute_dtype)

    xp = _pad2(x, Bp, Fp)
    Wtp = _pad2(Wt, Fp, Dp)
    bp = _pad2(b.reshape(1, D).astype(jnp.float32), 1, Dp)

    x_it, w_it = xp.dtype.itemsize, Wtp.dtype.itemsize
    o_it = jnp.dtype(out_dtype).itemsize
    ws = (2 * tm * tk * x_it + 2 * tk * tn * w_it + 2 * tm * tn * o_it
          + (tm * tn * 4 if nk > 1 else 0) + 2 * tn * 4)
    cost = pl.CostEstimate(
        flops=2 * Bp * Fp * Dp,
        bytes_accessed=x_it * Bp * Fp * (Dp // tn) + w_it * Fp * Dp * (Bp // tm)
        + o_it * Bp * Dp,
        transcendentals=0)

    if nk > 1:
        out = pl.pallas_call(
            _linear_kernel,
            out_shape=jax.ShapeDtypeStruct((Bp, Dp), out_dtype),
            grid_spec=pltpu.PrefetchScalarGridSpec(
                num_scalar_prefetch=0,
                grid=(Bp // tm, Dp // tn, nk),
                in_specs=[pl.BlockSpec((tm, tk), lambda i, j, k: (i, k)),
                          pl.BlockSpec((tk, tn), lambda i, j, k: (k, j)),
                          pl.BlockSpec((1, tn), lambda i, j, k: (0, j))],
                out_specs=pl.BlockSpec((tm, tn), lambda i, j, k: (i, j)),
                scratch_shapes=[pltpu.VMEM((tm, tn), jnp.float32)]),
            compiler_params=pltpu.CompilerParams(
                dimension_semantics=("parallel", "parallel", "arbitrary"),
                vmem_limit_bytes=_vmem_limit(ws)),
            cost_estimate=cost,
        )(xp, Wtp, bp)
    else:
        out = pl.pallas_call(
            _linear_nk1_kernel,
            out_shape=jax.ShapeDtypeStruct((Bp, Dp), out_dtype),
            grid_spec=pltpu.PrefetchScalarGridSpec(
                num_scalar_prefetch=0,
                grid=(Bp // tm, Dp // tn),
                in_specs=[pl.BlockSpec((tm, tk), lambda i, j: (i, 0)),
                          pl.BlockSpec((tk, tn), lambda i, j: (0, j)),
                          pl.BlockSpec((1, tn), lambda i, j: (0, j))],
                out_specs=pl.BlockSpec((tm, tn), lambda i, j: (i, j))),
            compiler_params=pltpu.CompilerParams(
                dimension_semantics=("parallel", "parallel"),
                vmem_limit_bytes=_vmem_limit(ws)),
            cost_estimate=cost,
        )(xp, Wtp, bp)
    return out[:B, :D]


def _linear_bn_pallas(x, Wt, b, gamma, beta, out_dtype, compute_dtype=None):
    """Fused Linear + BatchNorm1d (exact batch stats). Returns None if the
    full-batch-resident working set cannot fit the VMEM budget."""
    B, F = x.shape
    D = Wt.shape[1]
    Fp, Dp = _round_up(F, 128), _round_up(D, 128)
    tk = _pick_tile(Fp, 128, 1024)
    tn = _pick_tile(Dp, 128, 256)
    while Dp // tn < 2 and tn >= 256:       # >=2 parallel D tiles for v7x
        tn = _pick_tile(Dp, 128, tn // 2)

    if compute_dtype is not None and Dp // tn > 1:
        x = x.astype(compute_dtype)         # x is re-streamed once per D tile

    x_it, w_it = x.dtype.itemsize, Wt.dtype.itemsize
    o_it = jnp.dtype(out_dtype).itemsize

    def ws(tk_, tn_):
        # x + W + out blocks are double-buffered; the f32 accumulator is not.
        return (2 * B * tk_ * x_it + 2 * tk_ * tn_ * w_it
                + 2 * B * tn_ * o_it + B * tn_ * 4 + 6 * tn_ * 4)

    while ws(tk, tn) > _BN_VMEM_BUDGET and tk > 128:
        tk = _pick_tile(Fp, 128, tk // 2)
    while ws(tk, tn) > _BN_VMEM_BUDGET and tn > 128:
        tn = _pick_tile(Dp, 128, tn // 2)
    if ws(tk, tn) > _BN_VMEM_BUDGET:
        return None                         # batch too large for fused BN

    nk = Fp // tk
    xp = _pad2(x, B, Fp)                    # B never padded here (exact stats)
    Wtp = _pad2(Wt, Fp, Dp)
    bp = _pad2(b.reshape(1, D).astype(jnp.float32), 1, Dp)
    gp = _pad2(gamma.reshape(1, D).astype(jnp.float32), 1, Dp, 1.0)
    betap = _pad2(beta.reshape(1, D).astype(jnp.float32), 1, Dp)

    cost = pl.CostEstimate(
        flops=2 * B * Fp * Dp + 6 * B * Dp,
        bytes_accessed=x_it * B * Fp * (Dp // tn) + w_it * Fp * Dp + o_it * B * Dp,
        transcendentals=Dp)
    cparams = pltpu.CompilerParams(
        dimension_semantics=("parallel", "arbitrary") if nk > 1 else ("parallel",),
        vmem_limit_bytes=_vmem_limit(ws(tk, tn)))

    if nk > 1:
        out = pl.pallas_call(
            _linear_bn_kernel,
            out_shape=jax.ShapeDtypeStruct((B, Dp), out_dtype),
            grid_spec=pltpu.PrefetchScalarGridSpec(
                num_scalar_prefetch=0,
                grid=(Dp // tn, nk),
                in_specs=[pl.BlockSpec((B, tk), lambda j, k: (0, k)),
                          pl.BlockSpec((tk, tn), lambda j, k: (k, j)),
                          pl.BlockSpec((1, tn), lambda j, k: (0, j)),
                          pl.BlockSpec((1, tn), lambda j, k: (0, j)),
                          pl.BlockSpec((1, tn), lambda j, k: (0, j))],
                out_specs=pl.BlockSpec((B, tn), lambda j, k: (0, j)),
                scratch_shapes=[pltpu.VMEM((B, tn), jnp.float32)]),
            compiler_params=cparams, cost_estimate=cost,
        )(xp, Wtp, bp, gp, betap)
    else:
        out = pl.pallas_call(
            _linear_bn_nk1_kernel,
            out_shape=jax.ShapeDtypeStruct((B, Dp), out_dtype),
            grid_spec=pltpu.PrefetchScalarGridSpec(
                num_scalar_prefetch=0,
                grid=(Dp // tn,),
                in_specs=[pl.BlockSpec((B, tk), lambda j: (0, 0)),
                          pl.BlockSpec((tk, tn), lambda j: (0, j)),
                          pl.BlockSpec((1, tn), lambda j: (0, j)),
                          pl.BlockSpec((1, tn), lambda j: (0, j)),
                          pl.BlockSpec((1, tn), lambda j: (0, j))],
                out_specs=pl.BlockSpec((B, tn), lambda j: (0, j))),
            compiler_params=cparams, cost_estimate=cost,
        )(xp, Wtp, bp, gp, betap)
    return out[:, :D]


# ------------------------------- wrapper -------------------------------------

@functools.partial(jax.jit, static_argnames=("btype", "compute_dtype"))
def feat_bottleneck_forward(x, params, btype="ori", compute_dtype=None):
    """x: [B, F] or [B, ...] (flattened like torch's x.view(x.size(0), -1)).

    params: dict(weight=[D, F], bias=[D], gamma=[D], beta=[D]).
    compute_dtype: optional low-precision stream dtype (e.g. jnp.bfloat16);
        halves HBM bytes for W (and re-read x) streams, accumulation stays f32.
    """
    if x.ndim > 2:
        x = x.reshape(x.shape[0], -1)
    out_dtype = x.dtype
    W, b = params["weight"], params["bias"]

    # Transpose W once to [F, D]: canonical (M,K)x(K,N) MXU feed, no repeated
    # per-tile RHS transpose through the XLU.
    Wt = W.T
    if compute_dtype is not None:
        Wt = Wt.astype(compute_dtype)

    if btype != "bn":
        return _linear_pallas(x, Wt, b, out_dtype, compute_dtype)

    fused = _linear_bn_pallas(x, Wt, b, params["gamma"], params["beta"],
                              out_dtype, compute_dtype)
    if fused is not None:
        return fused

    # Batch too large for the fused kernel's VMEM budget: two-pass fallback
    # (tiled Pallas matmul, then batch-norm over the f32 result).
    # TODO(synk): replace the jnp stats/normalize pass with a Pallas
    # partial-sum (Σy, Σy²) kernel to keep everything on the custom-call path.
    y = _linear_pallas(x, Wt, b, jnp.float32, compute_dtype)
    mean = jnp.mean(y, axis=0, keepdims=True)
    var = jnp.mean((y - mean) ** 2, axis=0, keepdims=True)
    y = (y - mean) * (params["gamma"][None, :] * lax.rsqrt(var + BN_EPS))
    y = y + params["beta"][None, :]
    return y.astype(out_dtype)


# ------------------------------- test harness --------------------------------

def init_params(key, feature_dim, bottleneck_dim):
    """Deterministic synthetic parameters matching nn.Linear / BatchNorm1d."""
    kw, kb = jax.random.split(key)
    bound = 1.0 / jnp.sqrt(jnp.float32(feature_dim))
    weight = jax.random.uniform(
        kw, (bottleneck_dim, feature_dim), jnp.float32, -bound, bound)
    bias = jax.random.uniform(kb, (bottleneck_dim,), jnp.float32, -bound, bound)
    gamma = jnp.ones((bottleneck_dim,), jnp.float32)    # BatchNorm1d defaults
    beta = jnp.zeros((bottleneck_dim,), jnp.float32)
    return {"weight": weight, "bias": bias, "gamma": gamma, "beta": beta}


def _reference(x, params, btype):
    if x.ndim > 2:
        x = x.reshape(x.shape[0], -1)
    y = x @ params["weight"].T + params["bias"]
    if btype == "bn":
        mean = jnp.mean(y, axis=0, keepdims=True)
        var = jnp.mean((y - mean) ** 2, axis=0, keepdims=True)
        y = (y - mean) / jnp.sqrt(var + BN_EPS)
        y = y * params["gamma"] + params["beta"]
    return y


if __name__ == "__main__":
    key = jax.random.PRNGKey(0)

    # (B, C, H, W, bottleneck_dim): small shapes; the second config exercises
    # the multi-K-block accumulator path and the >=2-parallel-tile split.
    configs = [(8, 4, 4, 4, 32), (16, 8, 16, 16, 256)]
    ok = True
    for ci, (B, C, H, Wd, Db) in enumerate(configs):
        kx, kp = jax.random.split(jax.random.fold_in(key, ci))
        x = jax.random.normal(kx, (B, C, H, Wd), jnp.float32)
        params = init_params(kp, C * H * Wd, Db)
        for btype in ("ori", "bn"):
            out = jax.block_until_ready(
                feat_bottleneck_forward(x, params, btype=btype))
            ref = _reference(x, params, btype)
            if out.shape != ref.shape or not jnp.allclose(out, ref,
                                                          atol=1e-4, rtol=1e-4):
                ok = False
                print(f"mismatch cfg={ci} type={btype}: max err "
                      f"{jnp.max(jnp.abs(out - ref))}")
        # bf16 W / (re-read) x streams with f32 accumulation: looser tolerance.
        out = jax.block_until_ready(
            feat_bottleneck_forward(x, params, btype="ori",
                                    compute_dtype=jnp.bfloat16))
        ref = _reference(x, params, "ori")
        if out.shape != ref.shape or not jnp.allclose(out, ref,
                                                      atol=5e-2, rtol=5e-2):
            ok = False
            print(f"bf16 mismatch cfg={ci}: max err "
                  f"{jnp.max(jnp.abs(out - ref))}")

    if ok:
        print("KERNEL_OK")
</pallas_src>

<mosaic_0001>
module attributes {stable_mosaic.version = 11 : i64} {
  func.func @_linear_nk1_kernel(%arg0: i32, %arg1: i32, %arg2: memref<8x128xf32, #tpu.memory_space<vmem>>, %arg3: memref<128x128xf32, #tpu.memory_space<vmem>>, %arg4: memref<1x128xf32, #tpu.memory_space<vmem>>, %arg5: memref<8x128xf32, #tpu.memory_space<vmem>>) attributes {dimension_semantics = [#tpu.dimension_semantics<parallel>, #tpu.dimension_semantics<parallel>], iteration_bounds = array<i64: 1, 1>, scalar_prefetch = 0 : i64, scratch_operands = 0 : i64, tpu.core_type = #tpu.core_type<tc>, window_params = [{transform_indices = @transform_0, window_bounds = array<i64: 8, 128>}, {transform_indices = @transform_1, window_bounds = array<i64: 128, 128>}, {transform_indices = @transform_2, window_bounds = array<i64: 1, 128>}, {transform_indices = @transform_3, window_bounds = array<i64: 8, 128>}]} {
    %c0 = arith.constant 0 : index
    %c0_0 = arith.constant 0 : index
    %0 = vector.load %arg2[%c0, %c0_0] : memref<8x128xf32, #tpu.memory_space<vmem>>, vector<8x128xf32>
    %c0_1 = arith.constant 0 : index
    %c0_2 = arith.constant 0 : index
    %1 = vector.load %arg3[%c0_1, %c0_2] : memref<128x128xf32, #tpu.memory_space<vmem>>, vector<128x128xf32>
    %cst = arith.constant dense<0.000000e+00> : vector<8x128xf32>
    %2 = tpu.matmul %0, %1, %cst {dimension_numbers = #tpu.dot_dimension_numbers<[1], [0], [0], [1], [0, 0, 1, 1], [], []>} : vector<8x128xf32>, vector<128x128xf32>, vector<8x128xf32> -> vector<8x128xf32>
    %c0_3 = arith.constant 0 : index
    %c0_4 = arith.constant 0 : index
    %3 = vector.load %arg4[%c0_3, %c0_4] : memref<1x128xf32, #tpu.memory_space<vmem>>, vector<1x128xf32>
    %4 = vector.broadcast %3 : vector<1x128xf32> to vector<8x128xf32>
    %5 = arith.addf %2, %4 : vector<8x128xf32>
    %c0_5 = arith.constant 0 : index
    %c0_6 = arith.constant 0 : index
    %6 = vector.load %arg5[%c0_5, %c0_6] : memref<8x128xf32, #tpu.memory_space<vmem>>, vector<8x128xf32>
    tpu.vector_store %arg5[%c0_5, %c0_6], %5 {strides = array<i32>} : memref<8x128xf32, #tpu.memory_space<vmem>>, vector<8x128xf32>,
    return
  }
  func.func @transform_0(%arg0: i32, %arg1: i32) -> (i32, i32) {
    %c0_i32 = arith.constant 0 : i32
    %c0_i32_0 = arith.constant 0 : i32
    return %arg0, %c0_i32 : i32, i32
  }
  func.func @transform_1(%arg0: i32, %arg1: i32) -> (i32, i32) {
    %c0_i32 = arith.constant 0 : i32
    %c0_i32_0 = arith.constant 0 : i32
    return %c0_i32, %arg1 : i32, i32
  }
  func.func @transform_2(%arg0: i32, %arg1: i32) -> (i32, i32) {
    %c0_i32 = arith.constant 0 : i32
    %c0_i32_0 = arith.constant 0 : i32
    return %c0_i32, %arg1 : i32, i32
  }
  func.func @transform_3(%arg0: i32, %arg1: i32) -> (i32, i32) {
    %c0_i32 = arith.constant 0 : i32
    return %arg0, %arg1 : i32, i32
  }
}

</mosaic_0001>

<bundles_post_ra>
// kernel: feat_bottleneck_forward.1
= control target key start
LH: loop header
LB: loop body
LE: loop exit
PB: predicated region body
PF: predicated region fallthrough
CT: control target
= control target key end

     0   :  { %v202_v1 = vmov 0.0   ;;  %vm203_vm0 = vmmov 0   ;;  %s282_s0 = inlined_call_operand.vmem [shape: f32[8,128], index: 0, kind: input, shape index: {}]   ;;  %s283_s1 = inlined_call_operand.vmem [shape: f32[128,128], index: 1, kind: input, shape index: {}]   ;;  %s284_s2 = inlined_call_operand.vmem [shape: f32[1,128], index: 2, kind: input, shape index: {}]   ;;  %s285_s3 = inlined_call_operand.hbm [shape: f32[8,128], index: 3, kind: output, shape index: {}]  }
   0x1   :  { %v31_v0 = vld [vmem:[%s283_s1 + $0x78] sm:$0xff]  ;;  %142 = vmatprep.subr.mxu0 %v202_v1  ;;  %v30_v2 = vld [vmem:[%s283_s1 + $0x70] sm:$0xff]  ;;  %174 = vmatprep.mubr.msk.f32.mxu0 %vm203_vm0, %v202_v1  ;;  %v29_v3 = vld [vmem:[%s283_s1 + $0x68] sm:$0xff] }
   0x2   :  { %143 = vmatpush3.msra.mxu0 %v31_v0  ;;  %v28_v4 = vld [vmem:[%s283_s1 + $0x60] sm:$0xff] }
   0x3   :  { %144 = vmatprep.subr.mxu0 %v202_v1 }
   0x4   :  { %145 = vmatpush3.msra.mxu0 %v30_v2 }
   0x5   :  { %146 = vmatprep.subr.mxu0 %v202_v1 }
   0x6   :  { %147 = vmatpush3.msra.mxu0 %v29_v3 }
   0x7   :  { %8 = vsyncpa [#allocation3], 0  ;;  %148 = vmatprep.subr.mxu0 %v202_v1  ;;  %v27_v5 = vld [vmem:[%s283_s1 + $0x58] sm:$0xff]  ;;  %v26_v6 = vld [vmem:[%s283_s1 + $0x50] sm:$0xff]  ;;  %s204_s21 = smov [#allocation2]  }
   0x8   :  { %149 = vmatpush3.msra.mxu0 %v28_v4  ;;  %v25_v7 = vld [vmem:[%s283_s1 + $0x48] sm:$0xff]  ;;  %v24_v8 = vld [vmem:[%s283_s1 + $0x40] sm:$0xff]  ;;  %v23_v9 = vld [vmem:[%s283_s1 + $0x38] sm:$0xff]  ;;  %s116_s22 = sshll.u32 %s204_s21, 4  ;;  %s117_s22 = int_to_ptr.vmem [resolvable:$true] %s116_s22 }
   0x9   :  { %150 = vmatprep.subr.mxu0 %v202_v1  ;;  %v22_v10 = vld [vmem:[%s283_s1 + $0x30] sm:$0xff]  ;;  %v21_v11 = vld [vmem:[%s283_s1 + $0x28] sm:$0xff]  ;;  %v20_v12 = vld [vmem:[%s283_s1 + $0x20] sm:$0xff]  ;;  %p185_p1 = scmp.lt.s32.totalorder %s117_s22, %s117_s22 }
   0xa   :  { %151 = vmatpush3.msra.mxu0 %v27_v5  ;;  %v19_v13 = vld [vmem:[%s283_s1 + $0x18] sm:$0xff]  ;;  %v18_v14 = vld [vmem:[%s283_s1 + $0x10] sm:$0xff]  ;;  %v17_v15 = vld [vmem:[%s283_s1 + $0x8] sm:$0xff] }
   0xb   :  { %152 = vmatprep.subr.mxu0 %v202_v1  ;;  %v16_v16 = vld [vmem:[%s283_s1] sm:$0xff]  ;;  %s180_s1 = scalar_lea.vmem %s117_s22, 128 }
   0xc   :  { %153 = vmatpush3.msra.mxu0 %v26_v6  ;;  %v15_v17 = vld [vmem:[%s282_s0] sm:$0xff]  ;;  %p181_p0 = scmp.ne.s32.totalorder %s117_s22, %s180_s1  ;;  %p186_p2 = scmp.lt.s32.totalorder %s180_s1, %s180_s1 }
   0xd   :  { %154 = vmatprep.subr.mxu0 %v202_v1  ;;  %v124_v18 = vld [vmem:[%s284_s2] ss:$0 sm:$0xff] }
   0xe   :  { %155 = vmatpush3.msra.mxu0 %v25_v7  ;;  %p187_p3 = por %p186_p2, %p185_p1 }
   0xf   :  { %156 = vmatprep.subr.mxu0 %v202_v1 }
  0x10   :  { %157 = vmatpush3.msra.mxu0 %v24_v8  ;;  %p188_p4 = pnand %p187_p3, %p181_p0 }
  0x11   :  { %158 = vmatprep.subr.mxu0 %v202_v1 }
  0x12   :  { %159 = vmatpush3.msra.mxu0 %v23_v9 }
  0x13   :  { %160 = vmatprep.subr.mxu0 %v202_v1 }
  0x14   :  { %161 = vmatpush3.msra.mxu0 %v22_v10 }
  0x15   :  { %162 = vmatprep.subr.mxu0 %v202_v1 }
  0x16   :  { %163 = vmatpush3.msra.mxu0 %v21_v11 }
  0x17   :  { %164 = vmatprep.subr.mxu0 %v202_v1 }
  0x18   :  { %165 = vmatpush3.msra.mxu0 %v20_v12 }
  0x19   :  { %166 = vmatprep.subr.mxu0 %v202_v1 }
  0x1a   :  { %167 = vmatpush3.msra.mxu0 %v19_v13 }
  0x1b   :  { %168 = vmatprep.subr.mxu0 %v202_v1 }
  0x1c   :  { %169 = vmatpush3.msra.mxu0 %v18_v14 }
  0x1d   :  { %170 = vmatprep.subr.mxu0 %v202_v1 }
  0x1e   :  { %171 = vmatpush3.msra.mxu0 %v17_v15 }
  0x1f   :  { %172 = vmatprep.subr.mxu0 %v202_v1 }
  0x20   :  { %173 = vmatpush3.msra.mxu0 %v16_v16 }
  0x21   :  { %175 = vmatmul.mubr.f32.vlgmr.msra.gmra.mxu0 %v15_v17 }
  0xe1   :  { %v105_v19 = vpop.f32.mrf.mxu0 }
  0xe2   :  { %v106_v20 = vadd.f32 %v124_v18, %v105_v19 }
  0xe3   :  { %v176_v21 = vpop.f32.mrf.mxu0 }
  0xe4   :  { %109 = vst [vmem:[#allocation2] sm:$0xff] %v106_v20 }
  0xe5   :  { %191 = shalt.err (!%p188_p4)
}
  0xe6   :  { %119 = dma.vmem_to_hbm [thread:$0]  %s117_s22, 128, %s285_s3, [#allocation3]  }
  0xe7   :  { %200 = dma.done.wait [#allocation3], 128  }
  0xe8   :  { %201 = vsyncadd [#allocation3], 4294967168 }
  0xe9   :  { %123 = vsyncpa [#allocation3], 1 }

</bundles_post_ra>
